<compile_context>
chip_gen: v7x
topology: tpu7x:2x2x1
jax: 0.10.0
libtpu: 0.0.40
codegen_flags: <defaults>
</compile_context>

<pallas_src>
import jax
import jax.numpy as jnp
import numpy as np
from jax.experimental import pallas as pl
from jax.experimental.pallas import tpu as pltpu

_TILE_BUDGET_BYTES = 4 << 20      # ~4 MiB per block (v6e/v7x sweet spot)
_VMEM_LIMIT_BYTES = 32 << 20      # explicit: 4 double-buffered 4 MiB blocks fit on v5e too
_MAX_LANES_PER_BLOCK = 4096       # tile the lane axis past this (multiple of 128)


def _copy_kernel(x_ref, o_ref):
    # The only device-expressible part of aten.to(f32 -> f64): stream the bits.
    o_ref[...] = x_ref[...]


def _lane_dense_view(m: int, n: int):
    """Pick a 2-D view (rows, lanes) of the (m, n) f32 array for the copy kernel.

    The kernel is bit-preserving, so any factorization of the same element
    count is valid.  Prefer a lane-dense slab (lanes % 128 == 0, <= 1024) when
    the natural last dim is narrow, not a multiple of 128, or extremely wide.
    """
    if n % 128 == 0 and 128 <= n <= _MAX_LANES_PER_BLOCK:
        return m, n                               # already lane-dense, no reshape
    total = m * n
    for lanes in (1024, 512, 256, 128):
        if total % lanes == 0:
            return total // lanes, lanes
    return m, n                                   # ragged total: masked stores unavoidable


def _pick_tiles(rows: int, lanes: int, elem_bytes: int = 4):
    """Row tile (8-aligned, within byte budget) and lane tile (128-aligned)."""
    tn = lanes if lanes <= _MAX_LANES_PER_BLOCK else _MAX_LANES_PER_BLOCK
    rows_in_budget = max(8, (_TILE_BUDGET_BYTES // (tn * elem_bytes)) // 8 * 8)
    # Ragged rows are handled by the grid (pl.cdiv) + Pallas masking; we never
    # fall back to "tm = whole array" (fixes the review's ragged-M concern).
    tm = rows if rows <= rows_in_budget else rows_in_budget
    return tm, tn


def _device_bitcopy(x, rows: int, lanes: int, tm: int, tn: int, alias: bool):
    m, n = x.shape
    # Under jit this reshape is a free bitcast (same bytes, default layout).
    x2d = x.reshape(rows, lanes) if (rows, lanes) != (m, n) else x
    y2d = pl.pallas_call(
        _copy_kernel,
        out_shape=jax.ShapeDtypeStruct((rows, lanes), x.dtype),
        grid=(pl.cdiv(rows, tm), pl.cdiv(lanes, tn)),
        in_specs=[pl.BlockSpec((tm, tn), lambda i, j: (i, j))],
        out_specs=pl.BlockSpec((tm, tn), lambda i, j: (i, j)),
        # Only alias when the caller actually donates the buffer; otherwise the
        # alias forces a defensive copy and buys nothing (review item).
        input_output_aliases={0: 0} if alias else {},
        compiler_params=pltpu.CompilerParams(
            dimension_semantics=("parallel", "parallel"),
            vmem_limit_bytes=_VMEM_LIMIT_BYTES,
        ),
    )(x2d)
    return y2d.reshape(m, n)


_bitcopy_jit = jax.jit(_device_bitcopy, static_argnums=(1, 2, 3, 4, 5))
_bitcopy_donating = jax.jit(
    _device_bitcopy, static_argnums=(1, 2, 3, 4, 5), donate_argnums=(0,)
)


def to_dtype_float64(x, *, run_device_pass: bool = True, donate: bool = False) -> np.ndarray:
    """Equivalent of torch.ops.aten.to(x, dtype=torch.float64, layout=None, ...).

    run_device_pass=False is the review-recommended production path (the f64
    widening must finish on the host anyway).  donate=True makes the in-place
    alias real; the caller must not reuse `x` afterwards.
    """
    assert x.ndim == 2 and x.dtype == jnp.float32
    if not run_device_pass:
        return np.asarray(x).astype(np.float64)

    m, n = x.shape
    rows, lanes = _lane_dense_view(m, n)
    tm, tn = _pick_tiles(rows, lanes)
    fn = _bitcopy_donating if donate else _bitcopy_jit
    y32 = fn(x, rows, lanes, tm, tn, donate)

    # TODO(synk): Mosaic/TPU has no native float64; the exact f32->f64 widening
    # (lossless incl. subnormals/Inf/NaN) is finished on the host after the
    # device->host transfer that np.asarray performs.
    return np.asarray(y32).astype(np.float64)


if __name__ == "__main__":
    key = jax.random.PRNGKey(0)
    k1, k2, k3 = jax.random.split(key, 3)

    # 1) Module-sized example (lane-dense already); donate=True exercises the
    #    real in-place alias.  Snapshot to host *before* donating.
    x1 = jax.random.normal(k1, (64, 256), dtype=jnp.float32)
    x1_np = np.asarray(x1)
    y1 = to_dtype_float64(x1, donate=True)   # x1's buffer is consumed here
    y1 = jax.block_until_ready(y1)
    assert y1.dtype == np.float64 and y1.shape == (64, 256)
    np.testing.assert_array_equal(y1, x1_np.astype(np.float64))

    # 2) Ragged shape (neither dim 8/128-friendly): exercises the masked
    #    fallback and the review-recommended no-device-pass fast path.
    x2 = jax.random.normal(k2, (37, 53), dtype=jnp.float32)
    x2_np = np.asarray(x2)
    y2 = to_dtype_float64(x2, donate=False)
    np.testing.assert_array_equal(y2, x2_np.astype(np.float64))
    y2_fast = to_dtype_float64(x2, run_device_pass=False)
    np.testing.assert_array_equal(y2_fast, y2)

    # 3) Rows exceed one 4 MiB tile with a ragged tail: exercises the multi-step
    #    grid, 8-aligned row tiling, and Pallas masking of the last block.
    x3 = jax.random.normal(k3, (2052, 512), dtype=jnp.float32)
    x3_np = np.asarray(x3)
    y3 = to_dtype_float64(x3, donate=False)
    y3 = jax.block_until_ready(y3)
    np.testing.assert_array_equal(y3, x3_np.astype(np.float64))

    print("KERNEL_OK")
</pallas_src>

<mosaic_0001>
module attributes {stable_mosaic.version = 11 : i64} {
  func.func @_copy_kernel(%arg0: i32, %arg1: i32, %arg2: memref<64x256xf32, #tpu.memory_space<vmem>>, %arg3: memref<64x256xf32, #tpu.memory_space<vmem>>) attributes {dimension_semantics = [#tpu.dimension_semantics<parallel>, #tpu.dimension_semantics<parallel>], iteration_bounds = array<i64: 1, 1>, scalar_prefetch = 0 : i64, scratch_operands = 0 : i64, tpu.core_type = #tpu.core_type<tc>, window_params = [{transform_indices = @transform_0, window_bounds = array<i64: 64, 256>}, {transform_indices = @transform_1, window_bounds = array<i64: 64, 256>}]} {
    %c0 = arith.constant 0 : index
    %c0_0 = arith.constant 0 : index
    %0 = vector.load %arg2[%c0, %c0_0] : memref<64x256xf32, #tpu.memory_space<vmem>>, vector<64x256xf32>
    %c0_1 = arith.constant 0 : index
    %c0_2 = arith.constant 0 : index
    %1 = vector.load %arg3[%c0_1, %c0_2] : memref<64x256xf32, #tpu.memory_space<vmem>>, vector<64x256xf32>
    tpu.vector_store %arg3[%c0_1, %c0_2], %0 {strides = array<i32>} : memref<64x256xf32, #tpu.memory_space<vmem>>, vector<64x256xf32>,
    return
  }
  func.func @transform_0(%arg0: i32, %arg1: i32) -> (i32, i32) {
    %c0_i32 = arith.constant 0 : i32
    return %arg0, %arg1 : i32, i32
  }
  func.func @transform_1(%arg0: i32, %arg1: i32) -> (i32, i32) {
    %c0_i32 = arith.constant 0 : i32
    return %arg0, %arg1 : i32, i32
  }
}

</mosaic_0001>

<bundles_post_ra>
// kernel: _device_bitcopy.1
= control target key start
LH: loop header
LB: loop body
LE: loop exit
PB: predicated region body
PF: predicated region fallthrough
CT: control target
= control target key end

     0   :  { %6 = vsyncpa [#allocation3], 0  ;;  %s168_s0 = inlined_call_operand.hbm [shape: f32[64,256], index: 0, kind: input, shape index: {}, may-alias: {0,1}]   ;;  %s169_s1 = inlined_call_operand.hbm [shape: f32[64,256], index: 1, kind: output, shape index: {}, may-alias: {0,1}]  }
   0x1   :  { %7 = vsyncpa [#allocation4], 0  ;;  %s124_s6 = smov [#allocation2]   ;;  %s76_s10 = scalar_lea.hbm %s168_s0, 2048 }
   0x2   :  { %s13_s7 = sshll.u32 %s124_s6, 4  ;;  %p77_p0 = scmp.ne.s32.totalorder %s168_s0, %s76_s10  ;;  %s14_s7 = int_to_ptr.vmem [resolvable:$true] %s13_s7 }
   0x3   :  { %p80_p1 = scmp.lt.u32.totalorder %s76_s10, %s168_s0 }
   0x5   :  { %p82_p2 = pnand %p80_p1, %p77_p0 }
   0x7   :  { %85 = shalt.err (!%p82_p2)
}
   0x8   :  { %s86_s15 = scalar_lea.vmem %s14_s7, 2048  ;;  %p91_p4 = scmp.lt.s32.totalorder %s14_s7, %s14_s7 }
   0x9   :  { %p87_p3 = scmp.ne.s32.totalorder %s14_s7, %s86_s15  ;;  %p92_p5 = scmp.lt.s32.totalorder %s86_s15, %s86_s15 }
   0xb   :  { %p93_p6 = por %p92_p5, %p91_p4 }
   0xd   :  { %p94_p7 = pnand %p93_p6, %p87_p3 }
   0xf   :  { %97 = shalt.err (!%p94_p7)
}
  0x10   :  { %s125_s16 = smov 256   ;;  %s126_s17 = smov 16  }
  0x11   :  { %19 = dma.hbm_to_vmem [thread:$0]  %s168_s0, 2048, %s14_s7, [#allocation3], %s125_s16, %s125_s16, %s126_s17  }
  0x12   :  { %120 = dma.done.wait [#allocation3], 2048  }
  0x13   :  { %121 = vsyncadd [#allocation3], 4294965248  ;;  %v23_v0 = vld [vmem:[#allocation2] sm:$0xff]  ;;  %v24_v1 = vld [vmem:[#allocation2 + $0x8] sm:$0xff]  ;;  %s127_s20 = smov [#allocation5]  }
  0x14   :  { %v25_v2 = vld [vmem:[#allocation2 + $0x10] sm:$0xff]  ;;  %39 = vst [vmem:[#allocation5] sm:$0xff] %v23_v0  ;;  %40 = vst [vmem:[#allocation5 + $0x8] sm:$0xff] %v24_v1  ;;  %v26_v3 = vld [vmem:[#allocation2 + $0x18] sm:$0xff]  ;;  %s60_s21 = sshll.u32 %s127_s20, 4  ;;  %s61_s21 = int_to_ptr.vmem [resolvable:$true] %s60_s21 }
  0x15   :  { %41 = vst [vmem:[#allocation5 + $0x10] sm:$0xff] %v25_v2  ;;  %v27_v4 = vld [vmem:[#allocation2 + $0x20] sm:$0xff]  ;;  %v28_v5 = vld [vmem:[#allocation2 + $0x28] sm:$0xff]  ;;  %42 = vst [vmem:[#allocation5 + $0x18] sm:$0xff] %v26_v3  ;;  %s98_s0 = scalar_lea.vmem %s61_s21, 2048  ;;  %p103_p9 = scmp.lt.s32.totalorder %s61_s21, %s61_s21 }
  0x16   :  { %43 = vst [vmem:[#allocation5 + $0x20] sm:$0xff] %v27_v4  ;;  %44 = vst [vmem:[#allocation5 + $0x28] sm:$0xff] %v28_v5  ;;  %v29_v6 = vld [vmem:[#allocation2 + $0x30] sm:$0xff]  ;;  %v30_v7 = vld [vmem:[#allocation2 + $0x38] sm:$0xff]  ;;  %p99_p8 = scmp.ne.s32.totalorder %s61_s21, %s98_s0  ;;  %p104_p10 = scmp.lt.s32.totalorder %s98_s0, %s98_s0 }
  0x17   :  { %v31_v8 = vld [vmem:[#allocation2 + $0x40] sm:$0xff]  ;;  %45 = vst [vmem:[#allocation5 + $0x30] sm:$0xff] %v29_v6  ;;  %46 = vst [vmem:[#allocation5 + $0x38] sm:$0xff] %v30_v7  ;;  %v32_v9 = vld [vmem:[#allocation2 + $0x48] sm:$0xff] }
  0x18   :  { %47 = vst [vmem:[#allocation5 + $0x40] sm:$0xff] %v31_v8  ;;  %v33_v10 = vld [vmem:[#allocation2 + $0x50] sm:$0xff]  ;;  %v34_v11 = vld [vmem:[#allocation2 + $0x58] sm:$0xff]  ;;  %48 = vst [vmem:[#allocation5 + $0x48] sm:$0xff] %v32_v9  ;;  %p105_p11 = por %p104_p10, %p103_p9 }
  0x19   :  { %49 = vst [vmem:[#allocation5 + $0x50] sm:$0xff] %v33_v10  ;;  %50 = vst [vmem:[#allocation5 + $0x58] sm:$0xff] %v34_v11  ;;  %v35_v12 = vld [vmem:[#allocation2 + $0x60] sm:$0xff]  ;;  %v36_v13 = vld [vmem:[#allocation2 + $0x68] sm:$0xff] }
  0x1a   :  { %v37_v14 = vld [vmem:[#allocation2 + $0x70] sm:$0xff]  ;;  %51 = vst [vmem:[#allocation5 + $0x60] sm:$0xff] %v35_v12  ;;  %52 = vst [vmem:[#allocation5 + $0x68] sm:$0xff] %v36_v13  ;;  %v38_v15 = vld [vmem:[#allocation2 + $0x78] sm:$0xff]  ;;  %p106_p12 = pnand %p105_p11, %p99_p8 }
  0x1b   :  { %53 = vst [vmem:[#allocation5 + $0x70] sm:$0xff] %v37_v14  ;;  %54 = vst [vmem:[#allocation5 + $0x78] sm:$0xff] %v38_v15 }
  0x1c   :  { %109 = shalt.err (!%p106_p12)
}
  0x1d   :  { %s110_s24 = scalar_lea.hbm %s169_s1, 2048 }
  0x1e   :  { %p111_p13 = scmp.ne.s32.totalorder %s169_s1, %s110_s24  ;;  %p114_p0 = scmp.lt.u32.totalorder %s110_s24, %s169_s1 }
  0x20   :  { %p116_p1 = pnand %p114_p0, %p111_p13 }
  0x22   :  { %119 = shalt.err (!%p116_p1)
}
  0x23   :  { %66 = dma.vmem_to_hbm [thread:$0]  %s61_s21, 2048, %s169_s1, [#allocation4], %s125_s16, %s125_s16, %s126_s17  }
  0x24   :  { %122 = dma.done.wait [#allocation4], 2048  }
  0x25   :  { %123 = vsyncadd [#allocation4], 4294965248 }
  0x26   :  { %70 = vsyncpa [#allocation3], 1 }
  0x27   :  { %71 = vsyncpa [#allocation4], 1 }

</bundles_post_ra>
